<compile_context>
chip_gen: v6e
topology: v6e:2x2x1
jax: 0.10.0
libtpu: 0.0.40
codegen_flags: <defaults>
</compile_context>

<pallas_src>
import functools

import jax
import jax.numpy as jnp
from jax.experimental import pallas as pl
from jax.experimental.pallas import tpu as pltpu

_LANES = 128


def _lane_partner(v, offset):
    """Returns w with w[..., i] = v[..., (i + offset) % lanes] (XLU rotation)."""
    lanes = v.shape[-1]
    return pltpu.roll(v, shift=(-offset) % lanes, axis=v.ndim - 1)


def _bbox_kernel(a_ref, d_ref, o_ref):
    # a_ref / d_ref / o_ref: (tile_rows, 128) tiles of the flattened (B, N*4)
    # tensors.  Lane index mod 4 gives the box component:
    #   0: x1/dx   1: y1/dy   2: x2/dw   3: y2/dh
    a = a_ref[...].astype(jnp.float32)
    d = d_ref[...].astype(jnp.float32)

    lane = jax.lax.broadcasted_iota(jnp.int32, a.shape, dimension=1)
    comp = lane & 3
    is_lo = comp < 2  # lanes holding x1/y1 (resp. dx/dy)

    # Bring (x2, y2) onto the (x1, y1) lanes.
    a_hi = _lane_partner(a, +2)
    wh = a_hi - a                       # width  @comp0, height @comp1
    ctr = a + 0.5 * wh                  # c_x    @comp0, c_y    @comp1

    # deltas * [0.1, 0.1, 0.2, 0.2]
    dsc = d * jnp.where(is_lo, 0.1, 0.2)
    dwh = _lane_partner(dsc, +2)        # 0.2*dw @comp0, 0.2*dh @comp1

    pred_ctr = ctr + dsc * wh           # pred_cx @comp0, pred_cy @comp1
    pred_wh = jnp.exp(dwh) * wh         # pred_w  @comp0, pred_h  @comp1

    out_lo = pred_ctr - 0.5 * pred_wh   # x1' @comp0, y1' @comp1
    out_hi = pred_ctr + 0.5 * pred_wh   # x2' @comp0, y2' @comp1

    # Place x1'/y1' on lanes 4k/4k+1 and x2'/y2' on lanes 4k+2/4k+3.
    out = jnp.where(is_lo, out_lo, _lane_partner(out_hi, -2))
    o_ref[...] = out.astype(o_ref.dtype)


@functools.partial(jax.jit, static_argnames=("tile_rows",))
def bbox_transform(anchors, deltas, *, tile_rows=1024):
    """anchors, deltas: (B, N, 4) arrays; returns (B, N, 4) float32 boxes."""
    B, N, C = anchors.shape
    assert C == 4 and deltas.shape == anchors.shape
    assert tile_rows % 8 == 0

    total = N * 4
    rows = pl.cdiv(total, _LANES)
    padded = rows * _LANES

    a_flat = anchors.reshape(B, total)
    d_flat = deltas.reshape(B, total)
    if padded != total:  # N not a multiple of 32: zero-pad the flat view.
        pad = padded - total
        a_flat = jnp.pad(a_flat, ((0, 0), (0, pad)))
        d_flat = jnp.pad(d_flat, ((0, 0), (0, pad)))

    a3 = a_flat.reshape(B, rows, _LANES)
    d3 = d_flat.reshape(B, rows, _LANES)

    # Full-extent block if it fits, otherwise (tile_rows, 128) blocks
    # (multiple of the native (8, 128) tile; edge blocks handled by Pallas).
    tr = rows if rows <= tile_rows else tile_rows
    grid = (B, pl.cdiv(rows, tr))

    spec = pl.BlockSpec((None, tr, _LANES), lambda b, r: (b, r, 0))
    out3 = pl.pallas_call(
        _bbox_kernel,
        out_shape=jax.ShapeDtypeStruct((B, rows, _LANES), jnp.float32),
        grid=grid,
        in_specs=[spec, spec],
        out_specs=spec,
        compiler_params=pltpu.CompilerParams(
            dimension_semantics=("parallel", "parallel")
        ),
    )(a3, d3)

    out = out3.reshape(B, padded)
    if padded != total:
        out = out[:, :total]
    return out.reshape(B, N, 4)


def _reference(anchors, deltas):
    """Pure-JAX reference mirroring the PyTorch forward."""
    anchors = anchors.astype(jnp.float32)
    deltas = deltas.astype(jnp.float32)
    width = anchors[:, :, 2] - anchors[:, :, 0]
    height = anchors[:, :, 3] - anchors[:, :, 1]
    c_x = anchors[:, :, 0] + 0.5 * width
    c_y = anchors[:, :, 1] + 0.5 * height
    factor = jnp.array([[0.1, 0.1, 0.2, 0.2]], dtype=jnp.float32)
    d = deltas * factor
    pred_cx = c_x + d[:, :, 0] * width
    pred_cy = c_y + d[:, :, 1] * height
    pred_w = jnp.exp(d[:, :, 2]) * width
    pred_h = jnp.exp(d[:, :, 3]) * height
    return jnp.stack(
        [
            pred_cx - 0.5 * pred_w,
            pred_cy - 0.5 * pred_h,
            pred_cx + 0.5 * pred_w,
            pred_cy + 0.5 * pred_h,
        ],
        axis=2,
    )


if __name__ == "__main__":
    key = jax.random.PRNGKey(0)

    # Case 1: aligned N (multiple of 32).  Case 2: unaligned N (pad path).
    for case, (B, N) in enumerate([(2, 256), (1, 200)]):
        k1, k2, k3, key = jax.random.split(key, 4)

        # Valid anchors: x1,y1 in [0,100), widths/heights in [1,50].
        xy1 = jax.random.uniform(k1, (B, N, 2), minval=0.0, maxval=100.0)
        wh = jax.random.uniform(k2, (B, N, 2), minval=1.0, maxval=50.0)
        anchors = jnp.concatenate([xy1, xy1 + wh], axis=-1).astype(jnp.float32)
        deltas = jax.random.normal(k3, (B, N, 4), dtype=jnp.float32)

        out = bbox_transform(anchors, deltas)
        out = jax.block_until_ready(out)

        ref = _reference(anchors, deltas)
        assert out.shape == (B, N, 4)
        assert jnp.allclose(out, ref, atol=1e-4, rtol=1e-4), f"case {case} mismatch"

    print("KERNEL_OK")
</pallas_src>

<mosaic_0001>
module attributes {stable_mosaic.version = 11 : i64} {
  func.func @_bbox_kernel(%arg0: i32, %arg1: i32, %arg2: memref<1x8x128xf32, #tpu.memory_space<vmem>>, %arg3: memref<1x8x128xf32, #tpu.memory_space<vmem>>, %arg4: memref<1x8x128xf32, #tpu.memory_space<vmem>>) attributes {dimension_semantics = [#tpu.dimension_semantics<parallel>, #tpu.dimension_semantics<parallel>], iteration_bounds = array<i64: 2, 1>, scalar_prefetch = 0 : i64, scratch_operands = 0 : i64, tpu.core_type = #tpu.core_type<tc>, window_params = [{transform_indices = @transform_0, window_bounds = array<i64: 1, 8, 128>}, {transform_indices = @transform_1, window_bounds = array<i64: 1, 8, 128>}, {transform_indices = @transform_2, window_bounds = array<i64: 1, 8, 128>}]} {
    %c0 = arith.constant 0 : index
    %c0_0 = arith.constant 0 : index
    %c0_1 = arith.constant 0 : index
    %0 = vector.load %arg2[%c0, %c0_0, %c0_1] : memref<1x8x128xf32, #tpu.memory_space<vmem>>, vector<1x8x128xf32>
    %1 = vector.shape_cast %0 : vector<1x8x128xf32> to vector<8x128xf32>
    %c0_2 = arith.constant 0 : index
    %c0_3 = arith.constant 0 : index
    %c0_4 = arith.constant 0 : index
    %2 = vector.load %arg3[%c0_2, %c0_3, %c0_4] : memref<1x8x128xf32, #tpu.memory_space<vmem>>, vector<1x8x128xf32>
    %3 = vector.shape_cast %2 : vector<1x8x128xf32> to vector<8x128xf32>
    %4 = tpu.iota {dimensions = array<i32: 1>} : vector<8x128xi32>
    %c3_i32 = arith.constant 3 : i32
    %5 = vector.broadcast %c3_i32 : i32 to vector<8x128xi32>
    %6 = arith.andi %4, %5 : vector<8x128xi32>
    %c2_i32 = arith.constant 2 : i32
    %7 = vector.broadcast %c2_i32 : i32 to vector<8x128xi32>
    %8 = arith.cmpi slt, %6, %7 : vector<8x128xi32>
    %c126_i32 = arith.constant 126 : i32
    %9 = tpu.dynamic_rotate %1 by %c126_i32 dim 1 : vector<8x128xf32>, i32 -> vector<8x128xf32>
    %10 = arith.subf %9, %1 : vector<8x128xf32>
    %cst = arith.constant 5.000000e-01 : f32
    %11 = vector.broadcast %cst : f32 to vector<8x128xf32>
    %12 = arith.mulf %11, %10 : vector<8x128xf32>
    %13 = arith.addf %1, %12 : vector<8x128xf32>
    %cst_5 = arith.constant 1.000000e-01 : f32
    %cst_6 = arith.constant 2.000000e-01 : f32
    %14 = vector.broadcast %cst_5 : f32 to vector<8x128xf32>
    %15 = vector.broadcast %cst_6 : f32 to vector<8x128xf32>
    %16 = arith.select %8, %14, %15 : vector<8x128xi1>, vector<8x128xf32>
    %17 = arith.mulf %3, %16 : vector<8x128xf32>
    %c126_i32_7 = arith.constant 126 : i32
    %18 = tpu.dynamic_rotate %17 by %c126_i32_7 dim 1 : vector<8x128xf32>, i32 -> vector<8x128xf32>
    %19 = arith.mulf %17, %10 : vector<8x128xf32>
    %20 = arith.addf %13, %19 : vector<8x128xf32>
    %21 = math.exp %18 : vector<8x128xf32>
    %22 = arith.mulf %21, %10 : vector<8x128xf32>
    %cst_8 = arith.constant 5.000000e-01 : f32
    %23 = vector.broadcast %cst_8 : f32 to vector<8x128xf32>
    %24 = arith.mulf %23, %22 : vector<8x128xf32>
    %25 = arith.subf %20, %24 : vector<8x128xf32>
    %cst_9 = arith.constant 5.000000e-01 : f32
    %26 = vector.broadcast %cst_9 : f32 to vector<8x128xf32>
    %27 = arith.mulf %26, %22 : vector<8x128xf32>
    %28 = arith.addf %20, %27 : vector<8x128xf32>
    %c2_i32_10 = arith.constant 2 : i32
    %29 = tpu.dynamic_rotate %28 by %c2_i32_10 dim 1 : vector<8x128xf32>, i32 -> vector<8x128xf32>
    %30 = arith.select %8, %25, %29 : vector<8x128xi1>, vector<8x128xf32>
    %c0_11 = arith.constant 0 : index
    %c0_12 = arith.constant 0 : index
    %c0_13 = arith.constant 0 : index
    %31 = vector.load %arg4[%c0_11, %c0_12, %c0_13] : memref<1x8x128xf32, #tpu.memory_space<vmem>>, vector<1x8x128xf32>
    %32 = vector.shape_cast %31 : vector<1x8x128xf32> to vector<8x128xf32>
    %33 = vector.shape_cast %30 : vector<8x128xf32> to vector<1x8x128xf32>
    tpu.vector_store %arg4[%c0_11, %c0_12, %c0_13], %33 {strides = array<i32>} : memref<1x8x128xf32, #tpu.memory_space<vmem>>, vector<1x8x128xf32>,
    return
  }
  func.func @transform_0(%arg0: i32, %arg1: i32) -> (i32, i32, i32) {
    %c0_i32 = arith.constant 0 : i32
    %c0_i32_0 = arith.constant 0 : i32
    return %arg0, %arg1, %c0_i32 : i32, i32, i32
  }
  func.func @transform_1(%arg0: i32, %arg1: i32) -> (i32, i32, i32) {
    %c0_i32 = arith.constant 0 : i32
    %c0_i32_0 = arith.constant 0 : i32
    return %arg0, %arg1, %c0_i32 : i32, i32, i32
  }
  func.func @transform_2(%arg0: i32, %arg1: i32) -> (i32, i32, i32) {
    %c0_i32 = arith.constant 0 : i32
    %c0_i32_0 = arith.constant 0 : i32
    return %arg0, %arg1, %c0_i32 : i32, i32, i32
  }
}

</mosaic_0001>

<bundles_post_ra>
// kernel: bbox_transform.1
= control target key start
LH: loop header
LB: loop body
LE: loop exit
PB: predicated region body
PF: predicated region fallthrough
CT: control target
= control target key end

     0   :  { %s395_s9 = smov 0   ;;  %s397_s10 = smov 0   ;;  %s444_s0 = inlined_call_operand.vmem [shape: f32[2,8,128], index: 0, kind: input, shape index: {}]   ;;  %s445_s1 = inlined_call_operand.vmem [shape: f32[2,8,128], index: 1, kind: input, shape index: {}]   ;;  %s446_s2 = inlined_call_operand.vmem [shape: f32[2,8,128], index: 2, kind: output, shape index: {}]  }
   0x1   :  { %s399_s11 = smov 0  }
   0x2 LB: > { %s24_s12 = sadd.s32 1, %s371_s10  ;;  %p318_p0 = scmp.ge.s32.totalorder %s375_s11, 1  ;;  %s375_s11 = sphi %s399_s11, %s12_s11   ;;  %s371_s10 = sphi %s397_s10, %s450_s10   ;;  %s367_s9 = sphi %s395_s9, %s449_s9  }
   0x3   : > { %p26_p1 = scmp.ge.s32.totalorder %s24_s12, 2  ;;  %p144_p2 = scmp.lt.s32.totalorder %s375_s11, 3 }
   0x5   : > { %s452_s12 = smov (%p26_p1, %s24_s12), 0  ;;  %p145_p3 = pnand %p318_p0, %p144_p2 }
   0x6   : > { %p177_p4 = scmp.lt.s32.totalorder (!%p145_p3), %s367_s9, 1  ;;  %s378_s20 = smov (!%p145_p3), 126  }
   0x7   : > { %148 = sbr.rel (%p145_p3) target bundleno = 276 (0x114), region = 28  ;;  %s379_s21 = smov (!%p145_p3), 2  }
   0xc   : > { %v200_v0 = vlaneseq  ;;  %s454_s9 = smov (!%p177_p4, %s367_s9), 1  ;;  %v377_v5 = vmov 0.2  }
   0xd   : > { %s413_s13 = sshll.u32 %s454_s9, 3 }
   0xe   : > { %v201_v1 = vand.u32 127, %v200_v0  ;;  %s190_s16 = scalar_lea.vmem %s445_s1, %s413_s13  ;;  %s183_s19 = scalar_lea.vmem %s444_s0, %s413_s13 }
   0xf   : > { %v199_v3 = vld [vmem:[%s190_s16] sm:$0xff]  ;;  %s197_s24 = scalar_lea.vmem %s446_s2, %s413_s13 }
  0x10   : > { %v202_v2 = vand.u32 3, %v201_v1  ;;  %v198_v8 = vld [vmem:[%s183_s19] sm:$0xff] }
  0x12   : > { %vm419_vm0 = vcmp.lt.s32.totalorder %v202_v2, 2 }
  0x13   : > { %v209_v6 = vsel %vm419_vm0, 0.1, %v377_v5 }
  0x14   : > { %v210_v7 = vmul.f32 %v209_v6, %v199_v3 }
  0x16   : > { %211 = vrot.lane.b32.xlu0 %v210_v7, %s378_s20 }
  0x1a   : > { %204 = vrot.lane.b32.xlu0 %v198_v8, %s378_s20 }
  0x88   : > { %v212_v9 = vpop.permute.xlu0 %211 }
  0x89   : > { %v215_v10 = vmul.f32 1.442695, %v212_v9 }
  0x8b   : > { %351 = vpow2.f32 %v215_v10 }
  0x8c   : > { %v205_v11 = vpop.permute.xlu0 %204 }
  0x8d   : > { %v206_v12 = vsub.f32 %v205_v11, %v198_v8 }
  0x8f   : > { %v207_v13 = vmul.f32 0.5, %v206_v12  ;;  %v213_v14 = vmul.f32 %v210_v7, %v206_v12 }
  0x91   : > { %v208_v15 = vadd.f32 %v207_v13, %v198_v8 }
  0x93   : > { %v214_v18 = vadd.f32 %v213_v14, %v208_v15 }
  0x98   : > { %v352_v16 = vpop.eup %351 }
  0x99   : > { %v217_v17 = vmul.f32 %v352_v16, %v206_v12 }
  0x9b   : > { %v218_v19 = vmul.f32 0.5, %v217_v17 }
  0x9d   : > { %v220_v20 = vadd.f32 %v218_v19, %v214_v18  ;;  %v219_v21 = vsub.f32 %v214_v18, %v218_v19 }
  0x9f   : > { %221 = vrot.lane.b32.xlu1 %v220_v20, %s379_s21 }
 0x111   : > { %v222_v22 = vpop.permute.xlu1 %221 }
 0x112   : > { %v223_v23 = vsel %vm419_vm0, %v219_v21, %v222_v22 }
 0x113   : > { %224 = vst [vmem:[%s197_s24] sm:$0xff] %v223_v23 }
 0x114 PF: > { %s12_s11 = sadd.s32 1, %s375_s11   ;;  %s449_s9 = smov %s371_s10 }
 0x115   : > { %p9_p5 = scmp.ge.s32.totalorder %s12_s11, 4   ;;  %s450_s10 = smov %s452_s12 }
 0x117   :  { %11 = sbr.rel (!%p9_p5) target bundleno = 2 (0x2), region = 61 }

</bundles_post_ra>
